<compile_context>
chip_gen: v6e
topology: v6e:2x2x1
jax: 0.10.0
libtpu: 0.0.40
codegen_flags: <defaults>
</compile_context>

<pallas_src>
import jax
import jax.numpy as jnp
from jax.experimental import pallas as pl
from jax.experimental.pallas import tpu as pltpu


_LANES = 512                        # lane-dense block width (large multiple of 128)
_MAX_BLOCK_BYTES = 4 * 1024 * 1024  # per-buffer cap: 2 arrays x 2 bufs x 4 MiB = 16 MiB resident
_ROW_ALIGN = 32                     # sublane alignment safe for f32 / bf16 / int8
_MIN_PALLAS_BYTES = 256 * 1024      # below this, XLA's fused elementwise is strictly faster
_TARGET_GRID_STEPS = 8              # keep several parallel grid steps (v7x has 2 TCs/chip)
_VMEM_LIMIT_BYTES = 32 * 1024 * 1024  # explicit scoped-VMEM budget, safe on all generations


def _h_sigmoid_kernel(x_ref, o_ref):
    x = x_ref[...]
    # relu6(x + 3) / 6  ==  clamp(x + 3, 0, 6) * (1/6)
    o_ref[...] = (jnp.clip(x + 3.0, 0.0, 6.0) * (1.0 / 6.0)).astype(o_ref.dtype)


def _h_sigmoid_xla(x):
    # Plain-XLA fallback / fast path for tiny activations.
    return jnp.clip(x + 3.0, 0.0, 6.0) * (1.0 / 6.0)


def h_sigmoid(x: jax.Array, *, min_pallas_bytes: int = _MIN_PALLAS_BYTES) -> jax.Array:
    """h_sigmoid over any-shaped tensor (NCHW expected) via a Pallas TPU kernel."""
    itemsize = jnp.dtype(x.dtype).itemsize
    total = x.size
    if total == 0 or total * itemsize < min_pallas_bytes:
        # Tiny input: pallas_call launch + DMA setup overhead would dominate.
        return _h_sigmoid_xla(x)

    # --- flatten to a lane-dense 2D slab (rows, _LANES), padding the tail ----
    rows = pl.cdiv(total, _LANES)

    # Block rows: multiple of _ROW_ALIGN, capped by the per-buffer VMEM budget,
    # and small enough that the grid keeps >= _TARGET_GRID_STEPS parallel steps
    # when there is enough data (so both TensorCores on v7x get work).
    max_block_rows = max(
        _ROW_ALIGN,
        (_MAX_BLOCK_BYTES // (_LANES * itemsize)) // _ROW_ALIGN * _ROW_ALIGN,
    )
    want_block_rows = pl.cdiv(rows, _TARGET_GRID_STEPS)
    want_block_rows = pl.cdiv(want_block_rows, _ROW_ALIGN) * _ROW_ALIGN
    block_rows = min(max_block_rows, max(_ROW_ALIGN, want_block_rows))

    padded_rows = pl.cdiv(rows, block_rows) * block_rows
    padded_total = padded_rows * _LANES

    flat = x.reshape(-1)
    if padded_total != total:
        flat = jnp.pad(flat, (0, padded_total - total))
    x2d = flat.reshape(padded_rows, _LANES)

    grid = (padded_rows // block_rows,)

    out2d = pl.pallas_call(
        _h_sigmoid_kernel,
        out_shape=jax.ShapeDtypeStruct((padded_rows, _LANES), x.dtype),
        grid_spec=pltpu.PrefetchScalarGridSpec(
            num_scalar_prefetch=0,
            grid=grid,
            in_specs=[pl.BlockSpec((block_rows, _LANES), lambda i: (i, 0))],
            out_specs=pl.BlockSpec((block_rows, _LANES), lambda i: (i, 0)),
        ),
        compiler_params=pltpu.CompilerParams(
            dimension_semantics=("parallel",),
            vmem_limit_bytes=_VMEM_LIMIT_BYTES,
        ),
    )(x2d)

    out_flat = out2d.reshape(-1)
    if padded_total != total:
        out_flat = out_flat[:total]
    return out_flat.reshape(x.shape)


def _h_sigmoid_ref(x):
    # Independent reference matching PyTorch: relu6(x + 3) / 6
    return jnp.clip(x + 3.0, 0.0, 6.0) / 6.0


if __name__ == "__main__":
    key = jax.random.PRNGKey(0)
    k1, k2 = jax.random.split(key)

    # Small NCHW input consistent with a conv feature map (fast-path branch).
    x_small = jax.random.normal(k1, (2, 4, 16, 16), dtype=jnp.float32) * 4.0
    y_small = jax.block_until_ready(h_sigmoid(x_small))
    assert y_small.shape == x_small.shape and y_small.dtype == x_small.dtype
    assert jnp.allclose(y_small, _h_sigmoid_ref(x_small), atol=1e-6, rtol=1e-6)

    # Same small shape, but force the Pallas kernel path (exercises padding + kernel).
    y_small_k = jax.block_until_ready(h_sigmoid(x_small, min_pallas_bytes=0))
    assert y_small_k.shape == x_small.shape and y_small_k.dtype == x_small.dtype
    assert jnp.allclose(y_small_k, _h_sigmoid_ref(x_small), atol=1e-6, rtol=1e-6)

    # Moderately sized activation whose spatial dims are NOT multiples of 128:
    # exercises tail padding and a multi-step parallel grid through the kernel.
    x_med = jax.random.normal(k2, (2, 30, 56, 56), dtype=jnp.float32) * 4.0
    y_med = jax.block_until_ready(h_sigmoid(x_med))
    assert y_med.shape == x_med.shape and y_med.dtype == x_med.dtype
    assert jnp.allclose(y_med, _h_sigmoid_ref(x_med), atol=1e-6, rtol=1e-6)

    print("KERNEL_OK")
</pallas_src>

<mosaic_0001>
module attributes {stable_mosaic.version = 11 : i64} {
  func.func @_h_sigmoid_kernel(%arg0: i32, %arg1: memref<32x512xf32, #tpu.memory_space<vmem>>, %arg2: memref<32x512xf32, #tpu.memory_space<vmem>>) attributes {dimension_semantics = [#tpu.dimension_semantics<parallel>], iteration_bounds = array<i64: 1>, scalar_prefetch = 0 : i64, scratch_operands = 0 : i64, tpu.core_type = #tpu.core_type<tc>, window_params = [{transform_indices = @transform_0, window_bounds = array<i64: 32, 512>}, {transform_indices = @transform_1, window_bounds = array<i64: 32, 512>}]} {
    %c0 = arith.constant 0 : index
    %c0_0 = arith.constant 0 : index
    %0 = vector.load %arg1[%c0, %c0_0] : memref<32x512xf32, #tpu.memory_space<vmem>>, vector<32x512xf32>
    %cst = arith.constant 3.000000e+00 : f32
    %1 = vector.broadcast %cst : f32 to vector<32x512xf32>
    %2 = arith.addf %0, %1 : vector<32x512xf32>
    %cst_1 = arith.constant 0.000000e+00 : f32
    %cst_2 = arith.constant 6.000000e+00 : f32
    %3 = vector.broadcast %cst_1 : f32 to vector<32x512xf32>
    %4 = arith.maximumf %3, %2 : vector<32x512xf32>
    %5 = vector.broadcast %cst_2 : f32 to vector<32x512xf32>
    %6 = arith.minimumf %5, %4 : vector<32x512xf32>
    %cst_3 = arith.constant 0.166666672 : f32
    %7 = vector.broadcast %cst_3 : f32 to vector<32x512xf32>
    %8 = arith.mulf %6, %7 : vector<32x512xf32>
    %c0_4 = arith.constant 0 : index
    %c0_5 = arith.constant 0 : index
    %9 = vector.load %arg2[%c0_4, %c0_5] : memref<32x512xf32, #tpu.memory_space<vmem>>, vector<32x512xf32>
    tpu.vector_store %arg2[%c0_4, %c0_5], %8 {strides = array<i32>} : memref<32x512xf32, #tpu.memory_space<vmem>>, vector<32x512xf32>,
    return
  }
  func.func @transform_0(%arg0: i32) -> (i32, i32) {
    %c0_i32 = arith.constant 0 : i32
    %c0_i32_0 = arith.constant 0 : i32
    return %arg0, %c0_i32 : i32, i32
  }
  func.func @transform_1(%arg0: i32) -> (i32, i32) {
    %c0_i32 = arith.constant 0 : i32
    %c0_i32_0 = arith.constant 0 : i32
    return %arg0, %c0_i32 : i32, i32
  }
}

</mosaic_0001>

<bundles_post_ra>
// kernel: tpu_custom_call.1
= control target key start
LH: loop header
LB: loop body
LE: loop exit
PB: predicated region body
PF: predicated region fallthrough
CT: control target
= control target key end

     0   :  { %6 = vsyncpa [#allocation3], 0  ;;  %s210_s0 = inlined_call_operand.hbm [shape: f32[32,512], index: 0, kind: input, shape index: {}]   ;;  %s211_s1 = inlined_call_operand.hbm [shape: f32[32,512], index: 1, kind: output, shape index: {}]  }
   0x1   :  { %7 = vsyncpa [#allocation4], 0  ;;  %s184_s6 = smov [#allocation2]  }
   0x2   :  { %s13_s7 = sshll.u32 %s184_s6, 4  ;;  %s14_s7 = int_to_ptr.vmem [resolvable:$true] %s13_s7 }
   0x3   :  { %s148_s8 = scalar_lea.vmem %s14_s7, 2048  ;;  %p153_p1 = scmp.lt.s32.totalorder %s14_s7, %s14_s7 }
   0x4   :  { %p149_p0 = scmp.ne.s32.totalorder %s14_s7, %s148_s8  ;;  %p154_p2 = scmp.lt.s32.totalorder %s148_s8, %s148_s8 }
   0x6   :  { %p155_p3 = por %p154_p2, %p153_p1 }
   0x8   :  { %p156_p4 = pnand %p155_p3, %p149_p0 }
   0xa   :  { %159 = shalt.err (!%p156_p4)
}
   0xb   :  { %s185_s9 = smov 512   ;;  %s186_s10 = smov 32  }
   0xc   :  { %19 = dma.hbm_to_vmem [thread:$0]  %s210_s0, 2048, %s14_s7, [#allocation3], %s185_s9, %s185_s9, %s186_s10  }
   0xd   :  { %180 = dma.done.wait [#allocation3], 2048  }
   0xe   :  { %181 = vsyncadd [#allocation3], 4294965248  ;;  %v23_v0 = vld [vmem:[#allocation2] sm:$0xff]  ;;  %v24_v1 = vld [vmem:[#allocation2 + $0x8] sm:$0xff]  ;;  %s187_s0 = smov [#allocation5]  }
   0xf   :  { %v25_v2 = vld [vmem:[#allocation2 + $0x10] sm:$0xff]  ;;  %v39_v3 = vadd.f32 3.0, %v23_v0  ;;  %v40_v4 = vadd.f32 3.0, %v24_v1  ;;  %v26_v6 = vld [vmem:[#allocation2 + $0x18] sm:$0xff]  ;;  %v27_v7 = vld [vmem:[#allocation2 + $0x20] sm:$0xff]  ;;  %s124_s13 = sshll.u32 %s187_s0, 4  ;;  %s125_s13 = int_to_ptr.vmem [resolvable:$true] %s124_s13 }
  0x10   :  { %v41_v5 = vadd.f32 3.0, %v25_v2  ;;  %v28_v8 = vld [vmem:[#allocation2 + $0x28] sm:$0xff]  ;;  %v42_v9 = vadd.f32 3.0, %v26_v6  ;;  %v43_v10 = vadd.f32 3.0, %v27_v7  ;;  %v29_v12 = vld [vmem:[#allocation2 + $0x30] sm:$0xff]  ;;  %v30_v13 = vld [vmem:[#allocation2 + $0x38] sm:$0xff]  ;;  %p165_p6 = scmp.lt.s32.totalorder %s125_s13, %s125_s13 }
  0x11   :  { %v44_v11 = vadd.f32 3.0, %v28_v8  ;;  %v55_v14 = vmax.f32 %v39_v3, 0.0  ;;  %v56_v15 = vmax.f32 %v40_v4, 0.0  ;;  %v45_v17 = vadd.f32 3.0, %v29_v12  ;;  %v31_v22 = vld [vmem:[#allocation2 + $0x40] sm:$0xff]  ;;  %v32_v23 = vld [vmem:[#allocation2 + $0x48] sm:$0xff] }
  0x12   :  { %v57_v16 = vmax.f32 %v41_v5, 0.0  ;;  %v58_v18 = vmax.f32 %v42_v9, 0.0  ;;  %v59_v19 = vmax.f32 %v43_v10, 0.0  ;;  %v46_v21 = vadd.f32 3.0, %v30_v13  ;;  %v33_v28 = vld [vmem:[#allocation2 + $0x50] sm:$0xff]  ;;  %v34_v29 = vld [vmem:[#allocation2 + $0x58] sm:$0xff] }
  0x13   :  { %v60_v20 = vmax.f32 %v44_v11, 0.0  ;;  %v71_v24 = vmin.f32 %v55_v14, 6.0  ;;  %v72_v25 = vmin.f32 %v56_v15, 6.0  ;;  %v61_v27 = vmax.f32 %v45_v17, 0.0  ;;  %v35_v34 = vld [vmem:[#allocation2 + $0x60] sm:$0xff]  ;;  %v36_v35 = vld [vmem:[#allocation2 + $0x68] sm:$0xff] }
  0x14   :  { %v73_v26 = vmin.f32 %v57_v16, 6.0  ;;  %v74_v30 = vmin.f32 %v58_v18, 6.0  ;;  %v75_v31 = vmin.f32 %v59_v19, 6.0  ;;  %v62_v33 = vmax.f32 %v46_v21, 0.0  ;;  %v37_v50 = vld [vmem:[#allocation2 + $0x70] sm:$0xff]  ;;  %v38_v51 = vld [vmem:[#allocation2 + $0x78] sm:$0xff] }
  0x15   :  { %v76_v32 = vmin.f32 %v60_v20, 6.0  ;;  %v87_v36 = vmul.f32 0.16666667, %v71_v24  ;;  %v88_v37 = vmul.f32 0.16666667, %v72_v25  ;;  %v77_v42 = vmin.f32 %v61_v27, 6.0 }
  0x16   :  { %v89_v38 = vmul.f32 0.16666667, %v73_v26  ;;  %v90_v39 = vmul.f32 0.16666667, %v74_v30  ;;  %v91_v40 = vmul.f32 0.16666667, %v75_v31 }
  0x17   :  { %v92_v41 = vmul.f32 0.16666667, %v76_v32  ;;  %103 = vst [vmem:[#allocation5] sm:$0xff] %v87_v36  ;;  %104 = vst [vmem:[#allocation5 + $0x8] sm:$0xff] %v88_v37  ;;  %v78_v43 = vmin.f32 %v62_v33, 6.0  ;;  %v47_v44 = vadd.f32 3.0, %v31_v22 }
  0x18   :  { %105 = vst [vmem:[#allocation5 + $0x10] sm:$0xff] %v89_v38  ;;  %v48_v45 = vadd.f32 3.0, %v32_v23  ;;  %106 = vst [vmem:[#allocation5 + $0x18] sm:$0xff] %v90_v39  ;;  %v49_v46 = vadd.f32 3.0, %v33_v28  ;;  %v50_v47 = vadd.f32 3.0, %v34_v29  ;;  %v51_v48 = vadd.f32 3.0, %v35_v34 }
  0x19   :  { %107 = vst [vmem:[#allocation5 + $0x20] sm:$0xff] %v91_v40  ;;  %108 = vst [vmem:[#allocation5 + $0x28] sm:$0xff] %v92_v41  ;;  %v52_v49 = vadd.f32 3.0, %v36_v35  ;;  %v93_v52 = vmul.f32 0.16666667, %v77_v42  ;;  %v63_v54 = vmax.f32 %v47_v44, 0.0 }
  0x1a   :  { %v94_v53 = vmul.f32 0.16666667, %v78_v43  ;;  %v64_v55 = vmax.f32 %v48_v45, 0.0  ;;  %v65_v56 = vmax.f32 %v49_v46, 0.0  ;;  %v66_v57 = vmax.f32 %v50_v47, 0.0  ;;  %s160_s14 = scalar_lea.vmem %s125_s13, 2048 }
  0x1b   :  { %v67_v58 = vmax.f32 %v51_v48, 0.0  ;;  %v68_v59 = vmax.f32 %v52_v49, 0.0  ;;  %109 = vst [vmem:[#allocation5 + $0x30] sm:$0xff] %v93_v52  ;;  %v79_v60 = vmin.f32 %v63_v54, 6.0  ;;  %v53_v62 = vadd.f32 3.0, %v37_v50  ;;  %p161_p5 = scmp.ne.s32.totalorder %s125_s13, %s160_s14  ;;  %p166_p7 = scmp.lt.s32.totalorder %s160_s14, %s160_s14 }
  0x1c   :  { %110 = vst [vmem:[#allocation5 + $0x38] sm:$0xff] %v94_v53  ;;  %v80_v61 = vmin.f32 %v64_v55, 6.0  ;;  %v54_v63 = vadd.f32 3.0, %v38_v51  ;;  %v81_v0 = vmin.f32 %v65_v56, 6.0  ;;  %v82_v1 = vmin.f32 %v66_v57, 6.0 }
  0x1d   :  { %v83_v2 = vmin.f32 %v67_v58, 6.0  ;;  %v84_v3 = vmin.f32 %v68_v59, 6.0  ;;  %v95_v4 = vmul.f32 0.16666667, %v79_v60  ;;  %v69_v6 = vmax.f32 %v53_v62, 0.0  ;;  %p167_p8 = por %p166_p7, %p165_p6 }
  0x1e   :  { %v96_v5 = vmul.f32 0.16666667, %v80_v61  ;;  %v70_v7 = vmax.f32 %v54_v63, 0.0  ;;  %v97_v8 = vmul.f32 0.16666667, %v81_v0 }
  0x1f   :  { %v98_v9 = vmul.f32 0.16666667, %v82_v1  ;;  %v99_v10 = vmul.f32 0.16666667, %v83_v2  ;;  %111 = vst [vmem:[#allocation5 + $0x40] sm:$0xff] %v95_v4  ;;  %v85_v12 = vmin.f32 %v69_v6, 6.0  ;;  %p168_p9 = pnand %p167_p8, %p161_p5 }
  0x20   :  { %112 = vst [vmem:[#allocation5 + $0x48] sm:$0xff] %v96_v5  ;;  %v100_v11 = vmul.f32 0.16666667, %v84_v3  ;;  %v86_v13 = vmin.f32 %v70_v7, 6.0  ;;  %113 = vst [vmem:[#allocation5 + $0x50] sm:$0xff] %v97_v8 }
  0x21   :  { %114 = vst [vmem:[#allocation5 + $0x58] sm:$0xff] %v98_v9  ;;  %115 = vst [vmem:[#allocation5 + $0x60] sm:$0xff] %v99_v10  ;;  %v101_v14 = vmul.f32 0.16666667, %v85_v12 }
  0x22   :  { %116 = vst [vmem:[#allocation5 + $0x68] sm:$0xff] %v100_v11  ;;  %v102_v15 = vmul.f32 0.16666667, %v86_v13 }
  0x23   :  { %117 = vst [vmem:[#allocation5 + $0x70] sm:$0xff] %v101_v14 }
  0x24   :  { %118 = vst [vmem:[#allocation5 + $0x78] sm:$0xff] %v102_v15 }
  0x25   :  { %171 = shalt.err (!%p168_p9)
}
  0x26   :  { %130 = dma.vmem_to_hbm [thread:$0]  %s125_s13, 2048, %s211_s1, [#allocation4], %s185_s9, %s185_s9, %s186_s10  }
  0x27   :  { %182 = dma.done.wait [#allocation4], 2048  }
  0x28   :  { %183 = vsyncadd [#allocation4], 4294965248 }
  0x29   :  { %134 = vsyncpa [#allocation3], 1 }
  0x2a   :  { %135 = vsyncpa [#allocation4], 1 }

</bundles_post_ra>
